<compile_context>
chip_gen: v7x
topology: tpu7x:2x2x1
jax: 0.10.0
libtpu: 0.0.40
codegen_flags: <defaults>
</compile_context>

<pallas_src>
import jax
import jax.numpy as jnp
from jax import lax
from jax.experimental import pallas as pl
from jax.experimental.pallas import tpu as pltpu


def _qnet_kernel(x_ref, w1_ref, b1_ref, w2_ref, b2_ref, out_ref):
    # Weights are PyTorch-layout (out_features, in_features). Contract on the
    # last axis of both operands so the MXU consumes the transposed operand
    # directly -- no explicit `.T` (which would lower to an XLU transpose).
    x = x_ref[...]                                   # (tm, in)
    h = lax.dot_general(
        x, w1_ref[...],                              # (hidden, in)
        dimension_numbers=(((1,), (1,)), ((), ())),
        preferred_element_type=jnp.float32,
    ) + b1_ref[...]                                  # (1, hidden) broadcast
    h = jnp.maximum(h, 0.0)                          # ReLU
    y = lax.dot_general(
        h, w2_ref[...],                              # (out, hidden)
        dimension_numbers=(((1,), (1,)), ((), ())),
        preferred_element_type=jnp.float32,
    ) + b2_ref[...]                                  # (1, out) broadcast
    out_ref[...] = y.astype(out_ref.dtype)


def _forward_whole(state1, w1, b1, w2, b2):
    # Small-batch path: everything fits in a few vregs, so skip the grid /
    # auto-pipelining machinery entirely. Whole arrays live in VMEM.
    batch = state1.shape[0]
    output_size = w2.shape[0]
    vmem = pl.BlockSpec(memory_space=pltpu.MemorySpace.VMEM)
    return pl.pallas_call(
        _qnet_kernel,
        out_shape=jax.ShapeDtypeStruct((batch, output_size), jnp.float32),
        in_specs=[vmem, vmem, vmem, vmem, vmem],
        out_specs=vmem,
    )(state1, w1, b1, w2, b2)


def _forward_batched(state1, w1, b1, w2, b2, tm):
    # Large-batch path: tile only the batch axis. Weights/biases use constant
    # (0, 0) index_maps so they are DMA'd from HBM once and stay VMEM-resident
    # across grid iterations; x/out stream through the auto-pipeline.
    batch, input_size = state1.shape
    hidden_size = w1.shape[0]
    output_size = w2.shape[0]
    assert batch % tm == 0
    return pl.pallas_call(
        _qnet_kernel,
        out_shape=jax.ShapeDtypeStruct((batch, output_size), jnp.float32),
        grid=(batch // tm,),
        in_specs=[
            pl.BlockSpec((tm, input_size), lambda i: (i, 0)),
            pl.BlockSpec((hidden_size, input_size), lambda i: (0, 0)),
            pl.BlockSpec((1, hidden_size), lambda i: (0, 0)),
            pl.BlockSpec((output_size, hidden_size), lambda i: (0, 0)),
            pl.BlockSpec((1, output_size), lambda i: (0, 0)),
        ],
        out_specs=pl.BlockSpec((tm, output_size), lambda i: (i, 0)),
        compiler_params=pltpu.CompilerParams(
            dimension_semantics=("parallel",),   # lets v7x shard batch over 2 TCs
        ),
    )(state1, w1, b1, w2, b2)


def linear_qnet_forward(state1, state2, w1, b1, w2, b2, *, batch_tile=128):
    # state2 is unused by the reference forward pass; kept for signature parity.
    del state2
    batch = state1.shape[0]
    if batch >= 2 * batch_tile and batch % batch_tile == 0:
        return _forward_batched(state1, w1, b1, w2, b2, batch_tile)
    return _forward_whole(state1, w1, b1, w2, b2)


def init_params(key, input_size, hidden_size, output_size):
    # Deterministic init mimicking nn.Linear's uniform(-1/sqrt(fan_in), 1/sqrt(fan_in)).
    k1, k2, k3, k4 = jax.random.split(key, 4)
    bound1 = 1.0 / (input_size ** 0.5)
    bound2 = 1.0 / (hidden_size ** 0.5)
    w1 = jax.random.uniform(k1, (hidden_size, input_size), jnp.float32, -bound1, bound1)
    b1 = jax.random.uniform(k2, (1, hidden_size), jnp.float32, -bound1, bound1)
    w2 = jax.random.uniform(k3, (output_size, hidden_size), jnp.float32, -bound2, bound2)
    b2 = jax.random.uniform(k4, (1, output_size), jnp.float32, -bound2, bound2)
    return w1, b1, w2, b2


def _ref_forward(state1, w1, b1, w2, b2):
    return jnp.maximum(state1 @ w1.T + b1, 0.0) @ w2.T + b2


if __name__ == "__main__":
    key = jax.random.PRNGKey(0)
    k_x1, k_x2, k_big, k_p = jax.random.split(key, 4)

    batch, input_size, hidden_size, output_size = 2, 16, 32, 4
    state1 = jax.random.normal(k_x1, (batch, input_size), jnp.float32)
    state2 = jax.random.normal(k_x2, (batch, input_size), jnp.float32)  # unused
    w1, b1, w2, b2 = init_params(k_p, input_size, hidden_size, output_size)

    # Small-batch (no-grid, all-VMEM) path.
    out = linear_qnet_forward(state1, state2, w1, b1, w2, b2)
    out = jax.block_until_ready(out)
    ref = _ref_forward(state1, w1, b1, w2, b2)
    assert out.shape == (batch, output_size)
    assert jnp.allclose(out, ref, atol=1e-5, rtol=1e-5)

    # Batch-tiled path (resident weights, streamed batch, "parallel" axis).
    big_batch = 256
    big_state = jax.random.normal(k_big, (big_batch, input_size), jnp.float32)
    out_big = linear_qnet_forward(big_state, big_state, w1, b1, w2, b2)
    out_big = jax.block_until_ready(out_big)
    ref_big = _ref_forward(big_state, w1, b1, w2, b2)
    assert out_big.shape == (big_batch, output_size)
    assert jnp.allclose(out_big, ref_big, atol=1e-5, rtol=1e-5)

    print("KERNEL_OK")
</pallas_src>

<mosaic_0001>
module attributes {stable_mosaic.version = 11 : i64} {
  func.func @_qnet_kernel(%arg0: memref<2x16xf32, #tpu.memory_space<vmem>>, %arg1: memref<32x16xf32, #tpu.memory_space<vmem>>, %arg2: memref<1x32xf32, #tpu.memory_space<vmem>>, %arg3: memref<4x32xf32, #tpu.memory_space<vmem>>, %arg4: memref<1x4xf32, #tpu.memory_space<vmem>>, %arg5: memref<2x4xf32, #tpu.memory_space<vmem>>) attributes {dimension_semantics = [], scalar_prefetch = 0 : i64, scratch_operands = 0 : i64, tpu.core_type = #tpu.core_type<tc>} {
    %c0 = arith.constant 0 : index
    %c0_0 = arith.constant 0 : index
    %0 = vector.load %arg0[%c0, %c0_0] : memref<2x16xf32, #tpu.memory_space<vmem>>, vector<2x16xf32>
    %c0_1 = arith.constant 0 : index
    %c0_2 = arith.constant 0 : index
    %1 = vector.load %arg1[%c0_1, %c0_2] : memref<32x16xf32, #tpu.memory_space<vmem>>, vector<32x16xf32>
    %cst = arith.constant dense<0.000000e+00> : vector<2x32xf32>
    %2 = tpu.matmul %0, %1, %cst {dimension_numbers = #tpu.dot_dimension_numbers<[1], [1], [0], [0], [0, 0, 1, 0], [], []>} : vector<2x16xf32>, vector<32x16xf32>, vector<2x32xf32> -> vector<2x32xf32>
    %c0_3 = arith.constant 0 : index
    %c0_4 = arith.constant 0 : index
    %3 = vector.load %arg2[%c0_3, %c0_4] : memref<1x32xf32, #tpu.memory_space<vmem>>, vector<1x32xf32>
    %4 = vector.broadcast %3 : vector<1x32xf32> to vector<2x32xf32>
    %5 = arith.addf %2, %4 : vector<2x32xf32>
    %cst_5 = arith.constant 0.000000e+00 : f32
    %6 = vector.broadcast %cst_5 : f32 to vector<2x32xf32>
    %7 = arith.maximumf %5, %6 : vector<2x32xf32>
    %c0_6 = arith.constant 0 : index
    %c0_7 = arith.constant 0 : index
    %8 = vector.load %arg3[%c0_6, %c0_7] : memref<4x32xf32, #tpu.memory_space<vmem>>, vector<4x32xf32>
    %cst_8 = arith.constant dense<0.000000e+00> : vector<2x4xf32>
    %9 = tpu.matmul %7, %8, %cst_8 {dimension_numbers = #tpu.dot_dimension_numbers<[1], [1], [0], [0], [0, 0, 1, 0], [], []>} : vector<2x32xf32>, vector<4x32xf32>, vector<2x4xf32> -> vector<2x4xf32>
    %c0_9 = arith.constant 0 : index
    %c0_10 = arith.constant 0 : index
    %10 = vector.load %arg4[%c0_9, %c0_10] : memref<1x4xf32, #tpu.memory_space<vmem>>, vector<1x4xf32>
    %11 = vector.broadcast %10 : vector<1x4xf32> to vector<2x4xf32>
    %12 = arith.addf %9, %11 : vector<2x4xf32>
    %c0_11 = arith.constant 0 : index
    %c0_12 = arith.constant 0 : index
    %13 = vector.load %arg5[%c0_11, %c0_12] : memref<2x4xf32, #tpu.memory_space<vmem>>, vector<2x4xf32>
    tpu.vector_store %arg5[%c0_11, %c0_12], %12 {strides = array<i32>} : memref<2x4xf32, #tpu.memory_space<vmem>>, vector<2x4xf32>,
    return
  }
}

</mosaic_0001>

<bundles_post_ra>
// kernel: tpu_custom_call.1
= control target key start
LH: loop header
LB: loop body
LE: loop exit
PB: predicated region body
PF: predicated region fallthrough
CT: control target
= control target key end

     0   :  { %vm33_vm0 = vcmask 130048   ;;  %v289_v2 = vmov 0.0|0.0   ;;  %vm290_vm2 = vmmov 0   ;;  %v291_v4 = vmov 0.0   ;;  %s362_s0 = inlined_call_operand.vmem [shape: f32[2,16], index: 0, kind: input, shape index: {}]   ;;  %s363_s1 = inlined_call_operand.vmem [shape: f32[32,16], index: 1, kind: input, shape index: {}]   ;;  %s364_s2 = inlined_call_operand.vmem [shape: f32[1,32], index: 2, kind: input, shape index: {}]   ;;  %s365_s3 = inlined_call_operand.vmem [shape: f32[4,32], index: 3, kind: input, shape index: {}]   ;;  %s366_s4 = inlined_call_operand.vmem [shape: f32[1,4], index: 4, kind: input, shape index: {}]   ;;  %s367_s5 = inlined_call_operand.hbm [shape: f32[2,4], index: 5, kind: output, shape index: {}]  }
   0x1   :  { %v22_v0 = vld [vmem:[%s363_s1] sm:$0xff]  ;;  %v23_v1 = vld [vmem:[%s363_s1 + $0x8] sm:$0xff]  ;;  %253 = vmatprep.subr.bf16.mxu0 %v289_v2  ;;  %vm255_vm1 = vmpackc.low %vm33_vm0, %vm33_vm0  ;;  %245 = vmatprep.mubr.msk.f32.mxu0 %vm290_vm2, %v291_v4 }
   0x2   :  { %v254_v3 = vpack.c.bf16 %v23_v1, %v22_v0  ;;  %248 = vmatprep.subr.mxu1 %v291_v4 }
   0x3   :  { %10 = vsyncpa [#allocation3], 0  ;;  %250 = vmatprep.mubr.msk.f32.mxu1 %vm290_vm2, %v291_v4  ;;  %v24_v5 = vld [vmem:[%s363_s1 + $0x10] sm:$0xff]  ;;  %v25_v6 = vld [vmem:[%s363_s1 + $0x18] sm:$0xff]  ;;  %vm128_vm3 = vcmask 261120   ;;  %vm205_vm4 = vcmask 25600  }
   0x4   :  { %256 = vmatpush3.bf16.xpose.msk.msra.mxu0 %vm255_vm1, %v254_v3  ;;  %v258_v7 = vpack.c.bf16 %v25_v6, %v24_v5  ;;  %v21_v8 = vld [vmem:[%s362_s0] sm:$0x3]  ;;  %s292_s0 = smov [#allocation2]  }
   0x5   :  { %257 = vmatprep.subr.bf16.mxu0 %v289_v2  ;;  %v120_v9 = vld [vmem:[%s365_s3] sm:$0xf]  ;;  %s213_s8 = sshll.u32 %s292_s0, 4  ;;  %s214_s8 = int_to_ptr.vmem [resolvable:$true] %s213_s8 }
   0x6   :  { %249 = vmatpush3.xpose.msk.msra.mxu1 %vm128_vm3, %v120_v9  ;;  %v221_v10 = vld [vmem:[%s364_s2] ss:$0 sm:$0xff]  ;;  %s265_s3 = scalar_lea.vmem %s214_s8, 32  ;;  %p270_p1 = scmp.lt.s32.totalorder %s214_s8, %s214_s8 }
   0x7   :  { %v227_v15 = vld [vmem:[%s366_s4] ss:$0 sm:$0xff]  ;;  %p266_p0 = scmp.ne.s32.totalorder %s214_s8, %s265_s3  ;;  %p271_p2 = scmp.lt.s32.totalorder %s265_s3, %s265_s3 }
   0x9   :  { %p272_p3 = por %p271_p2, %p270_p1 }
   0xb   :  { %p273_p4 = pnand %p272_p3, %p266_p0 }
   0xc   :  { %260 = vmatpush3.bf16.xpose.msk.msra.mxu0 %vm255_vm1, %v258_v7 }
  0x13   :  { %246 = vmatmul.mubr.msk.f32.vlgmr.msra.gmra.mrb[0].mxu0 %vm33_vm0, %v21_v8 }
  0xe6   :  { %v115_v11 = vpop.f32.mrb[0].mxu0 }
  0xe7   :  { %v116_v12 = vadd.f32 %v221_v10, %v115_v11  ;;  %v247_v13 = vpop.f32.mrb[1].mxu0 }
  0xe9   :  { %v119_v14 = vmax.f32 %v116_v12, 0.0 }
  0xeb   :  { %251 = vmatmul.mubr.msk.f32.vlgmr.msra.gmra.mrb[0].mxu1 %vm128_vm3, %v119_v14 }
 0x1be   :  { %v201_v16 = vpop.f32.mrb[0].mxu1 }
 0x1bf   :  { %v202_v17 = vadd.f32 %v227_v15, %v201_v16  ;;  %v252_v18 = vpop.f32.mrb[1].mxu1 }
 0x1c1   :  { %206 = vst.msk [vmem:[#allocation2] sm:$0x3] %vm205_vm4, %v202_v17 }
 0x1c2   :  { %276 = shalt.err (!%p273_p4)
}
 0x1c3   :  { %s277_s10 = scalar_lea.hbm %s367_s5, 32 }
 0x1c4   :  { %p278_p5 = scmp.ne.s32.totalorder %s367_s5, %s277_s10  ;;  %p281_p6 = scmp.lt.u32.totalorder %s277_s10, %s367_s5 }
 0x1c6   :  { %p283_p7 = pnand %p281_p6, %p278_p5 }
 0x1c8   :  { %286 = shalt.err (!%p283_p7)
}
 0x1c9   :  { %216 = dma.vmem_to_hbm [thread:$0]  %s214_s8, 32, %s367_s5, [#allocation3]  }
 0x1ca   :  { %287 = dma.done.wait [#allocation3], 32  }
 0x1cb   :  { %288 = vsyncadd [#allocation3], 4294967264 }
 0x1cc   :  { %220 = vsyncpa [#allocation3], 1 }

</bundles_post_ra>
